<compile_context>
chip_gen: v5e
topology: v5e:2x2
jax: 0.10.0
libtpu: 0.0.40
codegen_flags: <defaults>
</compile_context>

<pallas_src>
import jax
import jax.numpy as jnp
import numpy as np
from jax.experimental import pallas as pl
from jax.experimental.pallas import tpu as pltpu


def _round_up(a, b):
    return (a + b - 1) // b * b


def _project_kernel(coef_ref, x_ref, o_ref):
    # coef_ref: (B, 12) f32 in SMEM; coef[b, 4*j + c] = inv(pose[b])[j, c], j in {0,1,2}
    # x_ref:    (1, 4, TN) f32 in VMEM -- channel-major, points on the lane axis
    # o_ref:    (1, 2, TN) f32 in VMEM
    b = pl.program_id(0)

    x0 = x_ref[0, 0:1, :]   # (1, TN)
    x1 = x_ref[0, 1:2, :]
    x2 = x_ref[0, 2:3, :]
    x3 = x_ref[0, 3:4, :]

    def cam_row(j):
        # VPU broadcast MAC with scalars read from SMEM (no MXU round-trip).
        return (coef_ref[b, 4 * j + 0] * x0
                + coef_ref[b, 4 * j + 1] * x1
                + coef_ref[b, 4 * j + 2] * x2
                + coef_ref[b, 4 * j + 3] * x3)

    u = cam_row(0)
    v = cam_row(1)
    z = cam_row(2)

    inv_z = pl.reciprocal(z, approx=False)   # exact; one reciprocal shared by u and v
    o_ref[0, 0:1, :] = (u * inv_z).astype(o_ref.dtype)
    o_ref[0, 1:2, :] = (v * inv_z).astype(o_ref.dtype)


def perspective_project_channel_major(xc, pose, *, tn_max=65536):
    """xc: (B, 4, N) float32 channel-major homogeneous points -> (B, 2, N)."""
    B, C, N = xc.shape
    assert C == 4 and pose.shape == (B, 4, 4)

    # decode_pose is the identity on `pose`; tiny 4x4 inverse is setup glue.
    minv = jnp.linalg.inv(pose).astype(jnp.float32)      # (B, 4, 4)
    coef = minv[:, :3, :].reshape(B, 12)                 # only the 3 rows we need

    # Lane-dense tile of points; pad N to a multiple of tn (no giant-block fallback).
    tn = min(tn_max, _round_up(N, 128))
    n_pad = _round_up(N, tn)
    xc = xc.astype(jnp.float32)
    if n_pad != N:
        xc = jnp.pad(xc, ((0, 0), (0, 0), (0, n_pad - N)), constant_values=1.0)

    out = pl.pallas_call(
        _project_kernel,
        out_shape=jax.ShapeDtypeStruct((B, 2, n_pad), jnp.float32),
        grid=(B, n_pad // tn),
        in_specs=[
            pl.BlockSpec(memory_space=pltpu.MemorySpace.SMEM),        # coef (B, 12)
            pl.BlockSpec((1, 4, tn), lambda b, n: (b, 0, n)),         # points
        ],
        out_specs=pl.BlockSpec((1, 2, tn), lambda b, n: (b, 0, n)),
        compiler_params=pltpu.CompilerParams(
            dimension_semantics=("parallel", "parallel"),
            vmem_limit_bytes=32 * 1024 * 1024,
        ),
    )(coef, xc)

    return out[:, :, :N]


def perspective_project(x, pose, *, tn_max=65536):
    """x: (B, H, W, 4), pose: (B, 4, 4) -> (B, H, W, 2)  (PyTorch layout)."""
    B, H, W, C = x.shape
    assert C == 4 and pose.shape == (B, 4, 4)
    N = H * W
    # channels-last (PyTorch) -> channel-major so the kernel's lane axis is points.
    xc = jnp.transpose(x.reshape(B, N, 4), (0, 2, 1))            # (B, 4, N)
    out = perspective_project_channel_major(xc, pose, tn_max=tn_max)  # (B, 2, N)
    return jnp.transpose(out, (0, 2, 1)).reshape(B, H, W, 2).astype(x.dtype)


def perspective_project_ref(x, pose):
    """Pure-JAX reference mirroring the PyTorch forward."""
    decoded = pose                                   # decode_pose is identity
    decoded = decoded[..., None, :, :]               # unsqueeze(-3)
    inv = jnp.linalg.inv(decoded)
    cam = jnp.matmul(x, jnp.swapaxes(inv, -1, -2))
    return cam[..., :2] / cam[..., 2:3]              # [..., -2:-1] == index 2


if __name__ == "__main__":
    key = jax.random.PRNGKey(0)
    k1, k2, k3 = jax.random.split(key, 3)

    B, H, W = 2, 16, 16
    x = jax.random.normal(k1, (B, H, W, 4), dtype=jnp.float32)
    # keep the depth (3rd homogeneous coord) safely away from zero and set w=1
    x = x.at[..., 2].set(2.0 + jax.random.uniform(k3, (B, H, W), jnp.float32))
    x = x.at[..., 3].set(1.0)

    # invertible poses: identity + small perturbation
    pose = (jnp.eye(4, dtype=jnp.float32)[None]
            + 0.1 * jax.random.normal(k2, (B, 4, 4), dtype=jnp.float32))

    out = jax.block_until_ready(perspective_project(x, pose))

    ref = perspective_project_ref(x, pose)
    np.testing.assert_allclose(np.asarray(out), np.asarray(ref),
                               rtol=1e-4, atol=1e-4)
    print("KERNEL_OK")
</pallas_src>

<mosaic_0001>
module attributes {stable_mosaic.version = 11 : i64} {
  func.func @_project_kernel(%arg0: i32, %arg1: i32, %arg2: memref<2x12xf32, #tpu.memory_space<smem>>, %arg3: memref<1x4x256xf32, #tpu.memory_space<vmem>>, %arg4: memref<1x2x256xf32, #tpu.memory_space<vmem>>) attributes {dimension_semantics = [#tpu.dimension_semantics<parallel>, #tpu.dimension_semantics<parallel>], iteration_bounds = array<i64: 2, 1>, scalar_prefetch = 0 : i64, scratch_operands = 0 : i64, tpu.core_type = #tpu.core_type<tc>, window_params = [{transform_indices = @transform_0, window_bounds = array<i64: 2, 12>}, {transform_indices = @transform_1, window_bounds = array<i64: 1, 4, 256>}, {transform_indices = @transform_2, window_bounds = array<i64: 1, 2, 256>}]} {
    %c0 = arith.constant 0 : index
    %c0_0 = arith.constant 0 : index
    %c0_1 = arith.constant 0 : index
    %0 = vector.load %arg3[%c0, %c0_0, %c0_1] : memref<1x4x256xf32, #tpu.memory_space<vmem>>, vector<1x1x256xf32>
    %1 = vector.shape_cast %0 : vector<1x1x256xf32> to vector<1x256xf32>
    %c0_2 = arith.constant 0 : index
    %c1 = arith.constant 1 : index
    %c0_3 = arith.constant 0 : index
    %2 = vector.load %arg3[%c0_2, %c1, %c0_3] : memref<1x4x256xf32, #tpu.memory_space<vmem>>, vector<1x1x256xf32>
    %3 = vector.shape_cast %2 : vector<1x1x256xf32> to vector<1x256xf32>
    %c0_4 = arith.constant 0 : index
    %c2 = arith.constant 2 : index
    %c0_5 = arith.constant 0 : index
    %4 = vector.load %arg3[%c0_4, %c2, %c0_5] : memref<1x4x256xf32, #tpu.memory_space<vmem>>, vector<1x1x256xf32>
    %5 = vector.shape_cast %4 : vector<1x1x256xf32> to vector<1x256xf32>
    %c0_6 = arith.constant 0 : index
    %c3 = arith.constant 3 : index
    %c0_7 = arith.constant 0 : index
    %6 = vector.load %arg3[%c0_6, %c3, %c0_7] : memref<1x4x256xf32, #tpu.memory_space<vmem>>, vector<1x1x256xf32>
    %7 = vector.shape_cast %6 : vector<1x1x256xf32> to vector<1x256xf32>
    %8 = arith.index_cast %arg0 : i32 to index
    %c0_8 = arith.constant 0 : index
    %9 = memref.load %arg2[%8, %c0_8] : memref<2x12xf32, #tpu.memory_space<smem>>
    %10 = vector.broadcast %9 : f32 to vector<1x256xf32>
    %11 = arith.mulf %10, %1 : vector<1x256xf32>
    %12 = arith.index_cast %arg0 : i32 to index
    %c1_9 = arith.constant 1 : index
    %13 = memref.load %arg2[%12, %c1_9] : memref<2x12xf32, #tpu.memory_space<smem>>
    %14 = vector.broadcast %13 : f32 to vector<1x256xf32>
    %15 = arith.mulf %14, %3 : vector<1x256xf32>
    %16 = arith.addf %11, %15 : vector<1x256xf32>
    %17 = arith.index_cast %arg0 : i32 to index
    %c2_10 = arith.constant 2 : index
    %18 = memref.load %arg2[%17, %c2_10] : memref<2x12xf32, #tpu.memory_space<smem>>
    %19 = vector.broadcast %18 : f32 to vector<1x256xf32>
    %20 = arith.mulf %19, %5 : vector<1x256xf32>
    %21 = arith.addf %16, %20 : vector<1x256xf32>
    %22 = arith.index_cast %arg0 : i32 to index
    %c3_11 = arith.constant 3 : index
    %23 = memref.load %arg2[%22, %c3_11] : memref<2x12xf32, #tpu.memory_space<smem>>
    %24 = vector.broadcast %23 : f32 to vector<1x256xf32>
    %25 = arith.mulf %24, %7 : vector<1x256xf32>
    %26 = arith.addf %21, %25 : vector<1x256xf32>
    %27 = arith.index_cast %arg0 : i32 to index
    %c4 = arith.constant 4 : index
    %28 = memref.load %arg2[%27, %c4] : memref<2x12xf32, #tpu.memory_space<smem>>
    %29 = vector.broadcast %28 : f32 to vector<1x256xf32>
    %30 = arith.mulf %29, %1 : vector<1x256xf32>
    %31 = arith.index_cast %arg0 : i32 to index
    %c5 = arith.constant 5 : index
    %32 = memref.load %arg2[%31, %c5] : memref<2x12xf32, #tpu.memory_space<smem>>
    %33 = vector.broadcast %32 : f32 to vector<1x256xf32>
    %34 = arith.mulf %33, %3 : vector<1x256xf32>
    %35 = arith.addf %30, %34 : vector<1x256xf32>
    %36 = arith.index_cast %arg0 : i32 to index
    %c6 = arith.constant 6 : index
    %37 = memref.load %arg2[%36, %c6] : memref<2x12xf32, #tpu.memory_space<smem>>
    %38 = vector.broadcast %37 : f32 to vector<1x256xf32>
    %39 = arith.mulf %38, %5 : vector<1x256xf32>
    %40 = arith.addf %35, %39 : vector<1x256xf32>
    %41 = arith.index_cast %arg0 : i32 to index
    %c7 = arith.constant 7 : index
    %42 = memref.load %arg2[%41, %c7] : memref<2x12xf32, #tpu.memory_space<smem>>
    %43 = vector.broadcast %42 : f32 to vector<1x256xf32>
    %44 = arith.mulf %43, %7 : vector<1x256xf32>
    %45 = arith.addf %40, %44 : vector<1x256xf32>
    %46 = arith.index_cast %arg0 : i32 to index
    %c8 = arith.constant 8 : index
    %47 = memref.load %arg2[%46, %c8] : memref<2x12xf32, #tpu.memory_space<smem>>
    %48 = vector.broadcast %47 : f32 to vector<1x256xf32>
    %49 = arith.mulf %48, %1 : vector<1x256xf32>
    %50 = arith.index_cast %arg0 : i32 to index
    %c9 = arith.constant 9 : index
    %51 = memref.load %arg2[%50, %c9] : memref<2x12xf32, #tpu.memory_space<smem>>
    %52 = vector.broadcast %51 : f32 to vector<1x256xf32>
    %53 = arith.mulf %52, %3 : vector<1x256xf32>
    %54 = arith.addf %49, %53 : vector<1x256xf32>
    %55 = arith.index_cast %arg0 : i32 to index
    %c10 = arith.constant 10 : index
    %56 = memref.load %arg2[%55, %c10] : memref<2x12xf32, #tpu.memory_space<smem>>
    %57 = vector.broadcast %56 : f32 to vector<1x256xf32>
    %58 = arith.mulf %57, %5 : vector<1x256xf32>
    %59 = arith.addf %54, %58 : vector<1x256xf32>
    %60 = arith.index_cast %arg0 : i32 to index
    %c11 = arith.constant 11 : index
    %61 = memref.load %arg2[%60, %c11] : memref<2x12xf32, #tpu.memory_space<smem>>
    %62 = vector.broadcast %61 : f32 to vector<1x256xf32>
    %63 = arith.mulf %62, %7 : vector<1x256xf32>
    %64 = arith.addf %59, %63 : vector<1x256xf32>
    %65 = tpu.reciprocal %64 : vector<1x256xf32> -> vector<1x256xf32>
    %66 = arith.mulf %26, %65 : vector<1x256xf32>
    %c0_12 = arith.constant 0 : index
    %c0_13 = arith.constant 0 : index
    %c0_14 = arith.constant 0 : index
    %67 = vector.load %arg4[%c0_12, %c0_13, %c0_14] : memref<1x2x256xf32, #tpu.memory_space<vmem>>, vector<1x1x256xf32>
    %68 = vector.shape_cast %67 : vector<1x1x256xf32> to vector<1x256xf32>
    %69 = vector.shape_cast %66 : vector<1x256xf32> to vector<1x1x256xf32>
    tpu.vector_store %arg4[%c0_12, %c0_13, %c0_14], %69 {strides = array<i32>} : memref<1x2x256xf32, #tpu.memory_space<vmem>>, vector<1x1x256xf32>,
    %70 = arith.mulf %45, %65 : vector<1x256xf32>
    %c0_15 = arith.constant 0 : index
    %c1_16 = arith.constant 1 : index
    %c0_17 = arith.constant 0 : index
    %71 = vector.load %arg4[%c0_15, %c1_16, %c0_17] : memref<1x2x256xf32, #tpu.memory_space<vmem>>, vector<1x1x256xf32>
    %72 = vector.shape_cast %71 : vector<1x1x256xf32> to vector<1x256xf32>
    %73 = vector.shape_cast %70 : vector<1x256xf32> to vector<1x1x256xf32>
    tpu.vector_store %arg4[%c0_15, %c1_16, %c0_17], %73 {strides = array<i32>} : memref<1x2x256xf32, #tpu.memory_space<vmem>>, vector<1x1x256xf32>,
    return
  }
  func.func @transform_0(%arg0: i32, %arg1: i32) -> (i32, i32) {
    %c0_i32 = arith.constant 0 : i32
    %c0_i32_0 = arith.constant 0 : i32
    %c0_i32_1 = arith.constant 0 : i32
    return %c0_i32, %c0_i32_0 : i32, i32
  }
  func.func @transform_1(%arg0: i32, %arg1: i32) -> (i32, i32, i32) {
    %c0_i32 = arith.constant 0 : i32
    %c0_i32_0 = arith.constant 0 : i32
    return %arg0, %c0_i32, %arg1 : i32, i32, i32
  }
  func.func @transform_2(%arg0: i32, %arg1: i32) -> (i32, i32, i32) {
    %c0_i32 = arith.constant 0 : i32
    %c0_i32_0 = arith.constant 0 : i32
    return %arg0, %c0_i32, %arg1 : i32, i32, i32
  }
}

</mosaic_0001>

<bundles_post_ra>
// kernel: tpu_custom_call.1
= control target key start
LH: loop header
LB: loop body
LE: loop exit
PB: predicated region body
PF: predicated region fallthrough
CT: control target
= control target key end

     0   :  { %s816_s0 = inlined_call_operand.hbm [shape: f32[2,12], index: 0, kind: input, shape index: {}]   ;;  %s817_s1 = inlined_call_operand.hbm [shape: f32[2,4,256], index: 1, kind: input, shape index: {}]   ;;  %s818_s2 = inlined_call_operand.hbm [shape: f32[2,2,256], index: 2, kind: output, shape index: {}]  }
   0x1   :  { %819 = sst [smem:[#allocation11_spill]] %s816_s0 }
   0x2   :  { %7 = vsyncpa [#allocation5], 0 }
   0x3   :  { %8 = vsyncpa [#allocation3], 0 }
   0x4   :  { %10 = vsyncpa [#allocation3 + $0x1], 0 }
   0x5   :  { %11 = vsyncpa [#allocation4], 0 }
   0x6   :  { %13 = vsyncpa [#allocation4 + $0x1], 0  ;;  %s646_s9 = smov 0   ;;  %s648_s10 = smov 0  }
   0x7   :  { %s650_s11 = smov 0   ;;  %s652_s12 = smov 0  }
   0x8   :  { %s654_s13 = smov 0   ;;  %s656_s14 = smov 0  }
   0x9 LB: > { %s398_s15 = sadd.s32 4294967295, %s628_s14   ;;  %s399_s16 = sadd.s32 4294967294, %s628_s14   ;;  %s628_s14 = sphi %s656_s14, %s19_s14   ;;  %s624_s13 = sphi %s654_s13, %s832_s13   ;;  %s620_s12 = sphi %s652_s12, %s831_s12   ;;  %s616_s11 = sphi %s650_s11, %s830_s11   ;;  %s612_s10 = sphi %s648_s10, %s829_s10   ;;  %s608_s9 = sphi %s646_s9, %s828_s9  }
   0xa   : > { %p74_p0 = scmp.ne.s32.totalorder %s612_s10, %s608_s9  ;;  %p680_p1 = scmp.eq.s32.totalorder %s398_s15, 0 }
   0xb   : > { %p684_p2 = scmp.eq.s32.totalorder %s398_s15, 1  ;;  %p106_p3 = scmp.eq.s32.totalorder %s399_s16, 1 }
   0xc   : > { %p690_p4 = por %p680_p1, %p74_p0  ;;  %p400_p5 = scmp.ge.s32.totalorder %s628_s14, 1 }
   0xd   : > { %p695_p6 = por %p106_p3, %p74_p0  ;;  %p113_p7 = scmp.lt.s32.totalorder %s628_s14, 3 }
   0xe   : > { %s824_s0 = sld [smem:[#allocation11_spill]]  ;;  %s31_s25 = sadd.s32 1, %s624_s13 }
   0xf   : > { %p703_p8 = pnand %p400_p5, %p113_p7  ;;  %s61_s26 = sadd.s32 1, %s616_s11 }
  0x10   : > { %p33_p12 = scmp.ge.s32.totalorder %s31_s25, 2  ;;  %s630_s27 = smov [#allocation2]  }
  0x11   : > { %p430_p10 = pneg %p703_p8  ;;  %p68_p13 = scmp.ne.s32.totalorder %s616_s11, %s612_s10 }
  0x12   : > { %s834_s25 = smov (%p33_p12, %s31_s25), 0  ;;  %p69_p0 = scmp.eq.s32.totalorder %s628_s14, 0 }
  0x13   : > { %p431_p11 = pnand %p430_p10, %p680_p1  ;;  %s56_s28 = ssub.s32 %s624_s13, %s834_s25 }
  0x14   : > { %s125_s23 = sshll.u32 %s824_s0, 4  ;;  %p443_p3 = scmp.lt.s32.totalorder %s628_s14, 2  ;;  %s126_s23 = int_to_ptr.hbm [resolvable:$true] %s125_s23 }
  0x15   : > { %433 = dma.hbm_to_smem (!%p431_p11), %s126_s23, 32, %s630_s27, [#allocation5]  }
  0x16   : > { %p59_p5 = scmp.eq.s32.totalorder %s56_s28, 0  ;;  %p70_p7 = por %p69_p0, %p68_p13 }
  0x17   : > { %p724_p9 = por %p684_p2, %p68_p13  ;;  %s136_s30 = sand.u32 1, %s616_s11  }
  0x18   : > { %s730_s3 = scalar_select %p59_p5, %s616_s11, %s61_s26  }
  0x19   : > { %s403_s4 = sshll.u32 %s136_s30, 3  ;;  %s420_s5 = sshll.u32 %s624_s13, 3 }
  0x1a   : > { %s147_s8 = scalar_lea.hbm %s817_s1, %s420_s5  ;;  %s140_s15 = scalar_lea.vmem [#allocation6], %s403_s4 }
  0x1b   : > { %s151_s16 = sshll.u32 %s140_s15, 4  ;;  %s149_s21 = sshll.u32 %s147_s8, 4  ;;  %s152_s16 = int_to_ptr.vmem [resolvable:$true] %s151_s16  ;;  %s150_s21 = int_to_ptr.hbm [resolvable:$true] %s149_s21 }
  0x1c   : > { %p435_p10 = pnand %p443_p3, %p70_p7  ;;  %s137_s18 = scalar_lea.sflag [#allocation3], %s136_s30 }
  0x1d   : > { %160 = sbr.rel (%p703_p8) target bundleno = 83 (0x53), region = 28 }
  0x1e   : > { %437 = dma.hbm_to_vmem [thread:$0]  (!%p435_p10), %s150_s21, 128, %s152_s16, %s137_s18  }
  0x22   : > { %595 = dma.done.wait (%p680_p1), [#allocation5], 32  }
  0x23   : > { %597 = vsyncadd (%p680_p1), [#allocation5], 4294967264  ;;  %s745_s22 = sand.u32 1, %s612_s10  }
  0x24   : > { %s408_s23 = sshll.u32 %s745_s22, 3  ;;  %s168_s26 = scalar_lea.sflag [#allocation3], %s745_s22 }
  0x25   : > { %s171_s27 = scalar_lea.vmem [#allocation6], %s408_s23 }
  0x26   : > { %599 = dma.done.wait (%p690_p4), %s168_s26, 128  }
  0x27   : > { %601 = vsyncadd (%p690_p4), %s168_s26, 4294967168 }
  0x28   : > { %177 = sfence }
  0x29   : > { %s754_s24 = sshll.u32 %s620_s12, 7  ;;  %v196_v0 = vld [vmem:[%s171_s27] ss:$4 sm:$0x3]  ;;  %v275_v42 = vlaneseq }
  0x2a   : > { %s207_s17 = sadd.s32 1, %s754_s24  ;;  %s758_s28 = sld [smem:[#allocation2 + %s754_s24]]  ;;  %v410_v1 = vld [vmem:[%s171_s27 + $0x1] ss:$4 sm:$0x3] }
  0x2b   : > { %s241_s30 = sadd.s32 8, %s754_s24  ;;  %s761_s4 = sld [smem:[#allocation2 + %s207_s17]]  ;;  %v411_v2 = vld [vmem:[%s171_s27 + $0x2] ss:$4 sm:$0x3]  ;;  %vm277_vm4 = vcmp.lt.s32.totalorder %v275_v42, 256 }
  0x2c   : > { %s245_s19 = sadd.s32 9, %s754_s24  ;;  %s242_s5 = sld [smem:[#allocation2 + %s241_s30]]  ;;  %v412_v4 = vld [vmem:[%s171_s27 + $0x3] ss:$4 sm:$0x3] }
  0x2d   : > { %s250_s6 = sadd.s32 10, %s754_s24  ;;  %s246_s7 = sld [smem:[#allocation2 + %s245_s19]] }
  0x2e   : > { %s255_s8 = sadd.s32 11, %s754_s24  ;;  %s251_s15 = sld [smem:[#allocation2 + %s250_s6]] }
  0x2f   : > { %s256_s16 = sld [smem:[#allocation2 + %s255_s8]]  ;;  %s222_s21 = sadd.s32 4, %s754_s24 }
  0x30   : > { %s226_s18 = sadd.s32 5, %s754_s24  ;;  %s768_s23 = sld [smem:[#allocation2 + %s222_s21]]  ;;  %v205_v14 = vstv %s758_s28 }
  0x31   : > { %s212_s26 = sadd.s32 2, %s754_s24  ;;  %s227_s17 = sld [smem:[#allocation2 + %s226_s18]]  ;;  %v209_v15 = vstv %s761_s4  ;;  %v206_v19 = vmul.f32 %v205_v14, %v196_v0 }
  0x32   : > { %v243_v3 = vstv %s242_s5  ;;  %s231_s30 = sadd.s32 6, %s754_s24  ;;  %s213_s19 = sld [smem:[#allocation2 + %s212_s26]]  ;;  %v210_v20 = vmul.f32 %v410_v1, %v209_v15 }
  0x33   : > { %v244_v5 = vmul.f32 %v243_v3, %v196_v0  ;;  %v247_v6 = vstv %s246_s7  ;;  %s217_s6 = sadd.s32 3, %s754_s24  ;;  %s232_s8 = sld [smem:[#allocation2 + %s231_s30]] }
  0x34   : > { %v248_v7 = vmul.f32 %v410_v1, %v247_v6  ;;  %v252_v8 = vstv %s251_s15  ;;  %s236_s21 = sadd.s32 7, %s754_s24  ;;  %s218_s0 = sld [smem:[#allocation2 + %s217_s6]]  ;;  %v211_v25 = vadd.f32 %v210_v20, %v206_v19 }
  0x35   : > { %v253_v9 = vmul.f32 %v411_v2, %v252_v8  ;;  %v257_v10 = vstv %s256_s16  ;;  %s237_s27 = sld [smem:[#allocation2 + %s236_s21]]  ;;  %s409_s24 = sshll.u32 %s745_s22, 2 }
  0x36   : > { %v249_v11 = vadd.f32 %v248_v7, %v244_v5  ;;  %v258_v12 = vmul.f32 %v412_v4, %v257_v10  ;;  %v224_v17 = vstv %s768_s23  ;;  %s421_s28 = sshll.u32 %s620_s12, 2  ;;  %s193_s7 = scalar_lea.vmem [#allocation7], %s409_s24 }
  0x37   : > { %v228_v18 = vstv %s227_s17  ;;  %v225_v22 = vmul.f32 %v224_v17, %v196_v0  ;;  %s297_s5 = scalar_lea.hbm %s818_s2, %s421_s28  ;;  %s299_s15 = sshll.u32 %s193_s7, 4  ;;  %s300_s15 = int_to_ptr.vmem [resolvable:$true] %s299_s15 }
  0x38   : > { %v254_v13 = vadd.f32 %v253_v9, %v249_v11  ;;  %v214_v21 = vstv %s213_s19  ;;  %v229_v23 = vmul.f32 %v410_v1, %v228_v18  ;;  %s301_s16 = sshll.u32 %s297_s5, 4  ;;  %s284_s12 = scalar_lea.sflag [#allocation4], %s745_s22  ;;  %s302_s16 = int_to_ptr.hbm [resolvable:$true] %s301_s16 }
  0x39   : > { %v233_v24 = vstv %s232_s8  ;;  %v215_v26 = vmul.f32 %v411_v2, %v214_v21  ;;  %s556_s18 = sshra.s32 %s302_s16, 4  ;;  %s562_s30 = scalar_lea.hbm %s818_s2, 8  ;;  %s557_s18 = int_to_ptr.hbm [resolvable:$true] %s556_s18 }
  0x3a   : > { %v259_v16 = vadd.f32 %v258_v12, %v254_v13  ;;  %v219_v27 = vstv %s218_s0  ;;  %v230_v28 = vadd.f32 %v229_v23, %v225_v22  ;;  %v234_v29 = vmul.f32 %v411_v2, %v233_v24  ;;  %s558_s23 = scalar_lea.hbm %s557_s18, 4  ;;  %p563_p8 = scmp.lt.s32.totalorder %s557_s18, %s818_s2 }
  0x3b   : > { %v238_v30 = vstv %s237_s27  ;;  %v220_v32 = vmul.f32 %v412_v4, %v219_v27  ;;  %v216_v34 = vadd.f32 %v215_v26, %v211_v25  ;;  %p559_p1 = scmp.ne.s32.totalorder %s557_s18, %s558_s23  ;;  %p564_p11 = scmp.lt.s32.totalorder %s562_s30, %s558_s23 }
  0x3c   : > { %495 = vrcp.f32 %v259_v16  ;;  %vm265_vm0 = vweird.f32 %v259_v16  ;;  %v271_v35 = vand.u32 2147483648, %v259_v16  ;;  %v239_v36 = vmul.f32 %v412_v4, %v238_v30 }
  0x3d   : > { %v269_v38 = vand.u32 2147483647, %v259_v16  ;;  %v235_v39 = vadd.f32 %v234_v29, %v230_v28  ;;  %v221_v43 = vadd.f32 %v220_v32, %v216_v34  ;;  %p560_p2 = pnand %p559_p1, %p724_p9  ;;  %p565_p12 = por %p564_p11, %p563_p8 }
  0x3e   : > { %v272_v41 = vor.u32 1.1754944e-38, %v271_v35 }
  0x3f   : > { %vm270_vm3 = vcmp.eq.f32.partialorder %v269_v38, 8.507059e+37  ;;  %v240_v45 = vadd.f32 %v239_v36, %v235_v39  ;;  %p561_p4 = pneg %p560_p2 }
  0x41   : > { %p566_p13 = pnand %p565_p12, %p561_p4 }
  0x42   : > { %v496_v31 = vpop.eup %495 }
  0x43   : > { %v261_v33 = vmul.f32 %v496_v31, %v259_v16  ;;  %vm266_vm1 = vweird.f32 %v496_v31 }
  0x44   : > { %vm267_vm2 = vmor %vm265_vm0, %vm266_vm1 }
  0x45   : > { %v262_v37 = vsub.f32 1.0, %v261_v33 }
  0x47   : > { %v263_v40 = vmul.f32 %v496_v31, %v262_v37 }
  0x49   : > { %v264_v44 = vadd.f32 %v496_v31, %v263_v40 }
  0x4b   : > { %v268_v46 = vsel %vm267_vm2, %v496_v31, %v264_v44 }
  0x4c   : > { %v273_v47 = vsel %vm270_vm3, %v272_v41, %v268_v46 }
  0x4d   : > { %v274_v48 = vmul.f32 %v273_v47, %v221_v43  ;;  %v280_v49 = vmul.f32 %v273_v47, %v240_v45 }
  0x4f   : > { %279 = vst.msk [vmem:[%s193_s7] ss:$2 sm:$0x3] %vm277_vm4, %v274_v48 }
  0x50   : > { %414 = vst.msk [vmem:[%s193_s7 + $0x1] ss:$2 sm:$0x3] %vm277_vm4, %v280_v49 }
  0x51   : > { %569 = shalt.err (!%p566_p13)
}
  0x52   : > { %428 = dma.vmem_to_hbm [thread:$0]  (%p724_p9), %s300_s15, 64, %s302_s16, %s284_s12  }
  0x53 PF: > { %s313_s22 = sand.u32 1, %s608_s9   ;;  %p827_p0 = scmp.ge.s32.totalorder %s628_s14, 2 }
  0x54   : > { %s314_s8 = scalar_lea.sflag [#allocation4], %s313_s22 }
  0x55   : > { %p439_p3 = pnand %p827_p0, %p695_p6 }
  0x57   : > { %p440_p5 = pneg %p439_p3 }
  0x59   : > { %603 = dma.done.wait (%p440_p5), %s314_s8, 64  }
  0x5a   : > { %605 = vsyncadd (%p440_p5), %s314_s8, 4294967232  ;;  %s19_s14 = sadd.s32 1, %s628_s14   ;;  %s828_s9 = smov %s612_s10 }
  0x5b   : > { %p16_p7 = scmp.ge.s32.totalorder %s19_s14, 4   ;;  %s829_s10 = smov %s616_s11 }
  0x5c   : > { %s830_s11 = smov %s730_s3  ;;  %s831_s12 = smov %s624_s13 }
  0x5d   : > { %s832_s13 = smov %s834_s25  ;;  %18 = sbr.rel (!%p16_p7) target bundleno = 9 (0x9), region = 82 }
  0x62   :  { %320 = vsyncpa [#allocation3], 1 }
  0x63   :  { %322 = vsyncpa [#allocation3 + $0x1], 1 }
  0x64   :  { %323 = vsyncpa [#allocation4], 1 }
  0x65   :  { %325 = vsyncpa [#allocation4 + $0x1], 1 }
  0x66   :  { %326 = vsyncpa [#allocation5], 1 }
  0x67   :  { %328 = vsyncpa [#allocation5 + $0x1], 1 }

</bundles_post_ra>
